<compile_context>
chip_gen: v7x
topology: tpu7x:2x2x1
jax: 0.10.0
libtpu: 0.0.40
codegen_flags: <defaults>
</compile_context>

<pallas_src>
from functools import partial

import jax
import jax.numpy as jnp
from jax.experimental import pallas as pl
from jax.experimental.pallas import tpu as pltpu


def _round_up(x, m):
    return (x + m - 1) // m * m


def _encoder_head_kernel(x_ref, w1_ref, b1_ref, w2_ref, b2_ref, o_ref, *,
                         n_sub, sub_m, mm_dtype):
    """One grid step: o = tanh(x @ W1 + b1) @ W2 + b2 for a [TM, D_in] row tile.

    The tile is processed in `n_sub` sub-blocks of `sub_m` rows so the EUP
    tanh of one sub-block can overlap the MXU matmuls of neighbouring
    sub-blocks (different VLIW slots) and the live f32 intermediate is small.
    """
    w1 = w1_ref[...]                       # [D_in,      D_inner_p]  (mm_dtype)
    w2 = w2_ref[...]                       # [D_inner_p, D_out_p]    (mm_dtype)
    b1 = b1_ref[...].astype(jnp.float32)   # [1, D_inner_p]
    b2 = b2_ref[...].astype(jnp.float32)   # [1, D_out_p]

    def compute(x):
        # bf16 (or native sub-32-bit) operands on the MXU, f32 accumulation.
        h = jnp.dot(x.astype(mm_dtype), w1, preferred_element_type=jnp.float32)
        h = jnp.tanh(h + b1)               # bias add + tanh in f32 (VPU / EUP)
        y = jnp.dot(h.astype(mm_dtype), w2, preferred_element_type=jnp.float32)
        return y + b2

    if n_sub == 1:
        o_ref[...] = compute(x_ref[...]).astype(o_ref.dtype)
    else:
        def sub_block(s, carry):
            r0 = pl.multiple_of(s * sub_m, sub_m)
            o_ref[pl.ds(r0, sub_m), :] = compute(
                x_ref[pl.ds(r0, sub_m), :]).astype(o_ref.dtype)
            return carry

        jax.lax.fori_loop(0, n_sub, sub_block, 0, unroll=True)


def _vmem_capacity_bytes():
    try:
        cap = getattr(pltpu.get_tpu_info(), "vmem_capacity_bytes", None)
        if cap:
            return int(cap)
    except Exception:
        pass
    return 64 * 1024 * 1024   # conservative default (v7x per-TC VMEM)


def _pick_tm(m, tm_max, sublane):
    """Row-tile size: multiple of the dtype-native sublane tile, >= 2 grid
    steps when possible (v7x megacore), last-tile waste kept <= ~12.5% of M."""
    tm_max = max(sublane, _round_up(tm_max, sublane))
    if m <= tm_max:
        full = _round_up(m, sublane)
        if full >= 2 * sublane:
            # Split into two steps so both v7x TensorCores get work.
            return _round_up((full + 1) // 2, sublane)
        return full
    tm_eff = tm_max
    while tm_eff > sublane and (_round_up(m, tm_eff) - m) * 8 > m:
        tm_eff = max(sublane, _round_up(tm_eff // 2, sublane))
    return tm_eff


def gpt2_encoder_head(hidden_states, w1, b1, w2, b2, *, tm=None,
                      matmul_dtype=None):
    """hidden_states: [..., D_in]; returns [..., D_out].

    Dropout is treated as identity (inference / p=0.0 path).
    """
    orig_shape = hidden_states.shape
    d_in = orig_shape[-1]
    d_inner = w1.shape[1]
    d_out = w2.shape[1]

    x2d = hidden_states.reshape(-1, d_in)
    m = x2d.shape[0]

    in_dtype = hidden_states.dtype
    out_dtype = in_dtype
    # Feed the MXU in bf16 (f32 operands run it in slow multi-pass mode);
    # sub-32-bit inputs keep their native dtype.  Accumulation is always f32.
    if matmul_dtype is None:
        mm_dtype = jnp.bfloat16 if in_dtype == jnp.float32 else in_dtype
    else:
        mm_dtype = matmul_dtype

    # Lane-dense padding of the *output* feature dims only (where the masked
    # vst penalty lives).  x's K dim stays unpadded: a block dim equal to the
    # full array dim bypasses the 128-lane rule, and padding x would cost a
    # full HBM read+write pass over the activations.
    d_inner_p = _round_up(d_inner, 128)
    d_out_p = _round_up(d_out, 128)

    w1_c = jnp.pad(w1, ((0, 0), (0, d_inner_p - d_inner))).astype(mm_dtype)
    b1_c = jnp.pad(b1.reshape(1, -1), ((0, 0), (0, d_inner_p - d_inner)))
    w2_c = jnp.pad(w2, ((0, d_inner_p - d_inner),
                        (0, d_out_p - d_out))).astype(mm_dtype)
    b2_c = jnp.pad(b2.reshape(1, -1), ((0, 0), (0, d_out_p - d_out)))

    x_itemsize = in_dtype.itemsize
    w_itemsize = w1_c.dtype.itemsize
    out_itemsize = out_dtype.itemsize
    # dtype-native sublane tile: 8 (f32) / 16 (bf16) / 32 (int8, fp8).
    sublane = max(8, 32 // x_itemsize)

    vmem_cap = _vmem_capacity_bytes()
    vmem_budget = int(vmem_cap * 0.8)   # headroom for compiler scratch / sems

    if tm is None:
        # Bigger row tiles on 128 MiB-VMEM chips (v5e/v6e); 512 on v7x (64 MiB).
        tm = 1024 if vmem_cap >= 96 * 1024 * 1024 else 512

    tm_eff = _pick_tm(m, tm, sublane)

    def vmem_est(t):
        sub = min(t, 256)
        return int(2 * t * d_in * x_itemsize                 # x tiles (2-buf)
                   + 2 * t * d_out_p * out_itemsize          # out tiles (2-buf)
                   + (d_in * d_inner_p + d_inner_p * d_out_p
                      + d_inner_p + d_out_p) * w_itemsize    # resident weights
                   + sub * d_inner_p * 4                     # f32 intermediate
                   + sub * max(d_in, d_out_p) * 4)           # cast slack

    # Degrade by shrinking TM (not by clamping the limit) if over budget.
    while tm_eff > sublane and vmem_est(tm_eff) > vmem_budget:
        tm_eff = max(sublane, _round_up(tm_eff // 2, sublane))

    m_p = _round_up(m, tm_eff)
    grid_m = m_p // tm_eff
    x_p = jnp.pad(x2d, ((0, m_p - m), (0, 0))) if m_p > m else x2d

    # In-kernel row sub-blocking (tanh of block i overlaps MXU of neighbours).
    sub_m = tm_eff
    for cand in (256, 128):
        c = _round_up(cand, sublane)
        if tm_eff > c and tm_eff % c == 0:
            sub_m = c
            break
    n_sub = tm_eff // sub_m

    vmem_limit = int(min(vmem_budget,
                         max(32 * 1024 * 1024, vmem_est(tm_eff) * 1.5)))

    cost = pl.CostEstimate(
        flops=int(2 * m * (d_in * d_inner_p + d_inner_p * d_out_p)),
        transcendentals=int(m * d_inner_p),
        bytes_accessed=int(x2d.size * x_itemsize
                           + (w1_c.size + w2_c.size) * w_itemsize
                           + b1_c.size * b1_c.dtype.itemsize
                           + b2_c.size * b2_c.dtype.itemsize
                           + m * d_out_p * out_itemsize),
    )

    kernel = partial(_encoder_head_kernel, n_sub=n_sub, sub_m=sub_m,
                     mm_dtype=mm_dtype)

    def make_call(single_buffer_weights):
        def resident(shape):
            # Constant index_map: the block never changes, so a single VMEM
            # buffer suffices (halves resident-weight footprint vs the default
            # double buffering -- matters on v7x's 64 MiB/TC).
            if single_buffer_weights:
                return pl.BlockSpec(shape, lambda i: (0, 0),
                                    pipeline_mode=pl.Buffered(1))
            return pl.BlockSpec(shape, lambda i: (0, 0))

        grid_spec = pltpu.PrefetchScalarGridSpec(
            num_scalar_prefetch=0,
            grid=(grid_m,),
            in_specs=[
                pl.BlockSpec((tm_eff, d_in), lambda i: (i, 0)),   # x row tile
                resident((d_in, d_inner_p)),                      # W1
                resident((1, d_inner_p)),                         # b1
                resident((d_inner_p, d_out_p)),                   # W2
                resident((1, d_out_p)),                           # b2
            ],
            out_specs=pl.BlockSpec((tm_eff, d_out_p), lambda i: (i, 0)),
        )
        return pl.pallas_call(
            kernel,
            out_shape=jax.ShapeDtypeStruct((m_p, d_out_p), out_dtype),
            grid_spec=grid_spec,
            compiler_params=pltpu.CompilerParams(
                dimension_semantics=("parallel",),
                vmem_limit_bytes=vmem_limit,
            ),
            cost_estimate=cost,
        )

    try:
        out_p = make_call(True)(x_p, w1_c, b1_c, w2_c, b2_c)
    except Exception:
        # pipeline_mode=pl.Buffered(1) unsupported on this jax version ->
        # fall back to default double buffering of the resident weights.
        out_p = make_call(False)(x_p, w1_c, b1_c, w2_c, b2_c)

    out = out_p[:m, :d_out]
    return out.reshape(*orig_shape[:-1], d_out)


def _init_params(key, input_dim, inner_dim, output_dim, dtype=jnp.float32):
    """Deterministic synthetic parameters (nn.Linear weights stored already
    transposed to [in, out] for the kernel)."""
    k1, k2, k3, k4 = jax.random.split(key, 4)
    w1 = jax.random.normal(k1, (input_dim, inner_dim), dtype) * 0.02
    b1 = jax.random.normal(k2, (inner_dim,), dtype) * 0.02
    w2 = jax.random.normal(k3, (inner_dim, output_dim), dtype) * 0.02
    b2 = jax.random.normal(k4, (output_dim,), dtype) * 0.02
    return w1, b1, w2, b2


if __name__ == "__main__":
    # TODO(synk): nn.Dropout is treated as identity (inference / p=0.0 path);
    # training-mode dropout masks are not implemented in-kernel.
    batch, seq, input_dim = 2, 8, 32
    inner_dim, output_dim = 64, 16

    key = jax.random.PRNGKey(0)
    kx, kp, kx2 = jax.random.split(key, 3)
    hidden_states = jax.random.normal(kx, (batch, seq, input_dim), jnp.float32)
    w1, b1, w2, b2 = _init_params(kp, input_dim, inner_dim, output_dim)

    out = gpt2_encoder_head(hidden_states, w1, b1, w2, b2)
    out = jax.block_until_ready(out)
    assert out.shape == (batch, seq, output_dim)

    # f32 reference (kernel feeds the MXU bf16 -> loose tolerance) ...
    ref_f32 = jnp.tanh(hidden_states @ w1 + b1) @ w2 + b2
    assert jnp.allclose(out, ref_f32, atol=5e-3, rtol=5e-2)

    # ... and a reference mimicking the kernel's bf16 matmul feeds (tight).
    h_ref = jnp.tanh(jnp.dot(hidden_states.astype(jnp.bfloat16),
                             w1.astype(jnp.bfloat16),
                             preferred_element_type=jnp.float32) + b1)
    ref_bf16 = jnp.dot(h_ref.astype(jnp.bfloat16), w2.astype(jnp.bfloat16),
                       preferred_element_type=jnp.float32) + b2
    assert jnp.allclose(out, ref_bf16, atol=5e-4, rtol=1e-3)

    # Larger case exercising the M grid, row padding and in-kernel sub-blocking.
    hidden2 = jax.random.normal(kx2, (4, 250, input_dim), jnp.float32)
    out2 = jax.block_until_ready(
        gpt2_encoder_head(hidden2, w1, b1, w2, b2, tm=512))
    ref2 = jnp.tanh(hidden2 @ w1 + b1) @ w2 + b2
    assert out2.shape == (4, 250, output_dim)
    assert jnp.allclose(out2, ref2, atol=5e-3, rtol=5e-2)

    print("KERNEL_OK")
</pallas_src>

<mosaic_0001>
module attributes {stable_mosaic.version = 11 : i64} {
  func.func @_encoder_head_kernel(%arg0: i32, %arg1: memref<8x32xf32, #tpu.memory_space<vmem>>, %arg2: memref<32x128xbf16, #tpu.memory_space<vmem>>, %arg3: memref<1x128xf32, #tpu.memory_space<vmem>>, %arg4: memref<128x128xbf16, #tpu.memory_space<vmem>>, %arg5: memref<1x128xf32, #tpu.memory_space<vmem>>, %arg6: memref<8x128xf32, #tpu.memory_space<vmem>>) attributes {dimension_semantics = [#tpu.dimension_semantics<parallel>], iteration_bounds = array<i64: 2>, scalar_prefetch = 0 : i64, scratch_operands = 0 : i64, tpu.core_type = #tpu.core_type<tc>, window_params = [{transform_indices = @transform_0, window_bounds = array<i64: 8, 32>}, {pipeline_mode = #tpu.pipeline_mode<synchronous>, transform_indices = @transform_1, window_bounds = array<i64: 32, 128>}, {pipeline_mode = #tpu.pipeline_mode<synchronous>, transform_indices = @transform_2, window_bounds = array<i64: 1, 128>}, {pipeline_mode = #tpu.pipeline_mode<synchronous>, transform_indices = @transform_3, window_bounds = array<i64: 128, 128>}, {pipeline_mode = #tpu.pipeline_mode<synchronous>, transform_indices = @transform_4, window_bounds = array<i64: 1, 128>}, {transform_indices = @transform_5, window_bounds = array<i64: 8, 128>}]} {
    %c0 = arith.constant 0 : index
    %c0_0 = arith.constant 0 : index
    %0 = vector.load %arg2[%c0, %c0_0] : memref<32x128xbf16, #tpu.memory_space<vmem>>, vector<32x128xbf16>
    %c0_1 = arith.constant 0 : index
    %c0_2 = arith.constant 0 : index
    %1 = vector.load %arg4[%c0_1, %c0_2] : memref<128x128xbf16, #tpu.memory_space<vmem>>, vector<128x128xbf16>
    %c0_3 = arith.constant 0 : index
    %c0_4 = arith.constant 0 : index
    %2 = vector.load %arg3[%c0_3, %c0_4] : memref<1x128xf32, #tpu.memory_space<vmem>>, vector<1x128xf32>
    %c0_5 = arith.constant 0 : index
    %c0_6 = arith.constant 0 : index
    %3 = vector.load %arg5[%c0_5, %c0_6] : memref<1x128xf32, #tpu.memory_space<vmem>>, vector<1x128xf32>
    %c0_7 = arith.constant 0 : index
    %c0_8 = arith.constant 0 : index
    %4 = vector.load %arg1[%c0_7, %c0_8] : memref<8x32xf32, #tpu.memory_space<vmem>>, vector<8x32xf32>
    %5 = arith.truncf %4 : vector<8x32xf32> to vector<8x32xbf16>
    %cst = arith.constant dense<0.000000e+00> : vector<8x128xf32>
    %6 = tpu.matmul %5, %0, %cst {dimension_numbers = #tpu.dot_dimension_numbers<[1], [0], [0], [1], [0, 0, 1, 1], [], []>} : vector<8x32xbf16>, vector<32x128xbf16>, vector<8x128xf32> -> vector<8x128xf32>
    %7 = vector.broadcast %2 : vector<1x128xf32> to vector<8x128xf32>
    %8 = arith.addf %6, %7 : vector<8x128xf32>
    %9 = math.tanh %8 : vector<8x128xf32>
    %10 = arith.truncf %9 : vector<8x128xf32> to vector<8x128xbf16>
    %cst_9 = arith.constant dense<0.000000e+00> : vector<8x128xf32>
    %11 = tpu.matmul %10, %1, %cst_9 {dimension_numbers = #tpu.dot_dimension_numbers<[1], [0], [0], [1], [0, 0, 1, 1], [], []>} : vector<8x128xbf16>, vector<128x128xbf16>, vector<8x128xf32> -> vector<8x128xf32>
    %12 = vector.broadcast %3 : vector<1x128xf32> to vector<8x128xf32>
    %13 = arith.addf %11, %12 : vector<8x128xf32>
    %c0_10 = arith.constant 0 : index
    %c0_11 = arith.constant 0 : index
    %14 = vector.load %arg6[%c0_10, %c0_11] : memref<8x128xf32, #tpu.memory_space<vmem>>, vector<8x128xf32>
    tpu.vector_store %arg6[%c0_10, %c0_11], %13 {strides = array<i32>} : memref<8x128xf32, #tpu.memory_space<vmem>>, vector<8x128xf32>,
    return
  }
  func.func @transform_0(%arg0: i32) -> (i32, i32) {
    %c0_i32 = arith.constant 0 : i32
    %c0_i32_0 = arith.constant 0 : i32
    return %arg0, %c0_i32 : i32, i32
  }
  func.func @transform_1(%arg0: i32) -> (i32, i32) {
    %c0_i32 = arith.constant 0 : i32
    %c0_i32_0 = arith.constant 0 : i32
    %c0_i32_1 = arith.constant 0 : i32
    return %c0_i32, %c0_i32_0 : i32, i32
  }
  func.func @transform_2(%arg0: i32) -> (i32, i32) {
    %c0_i32 = arith.constant 0 : i32
    %c0_i32_0 = arith.constant 0 : i32
    %c0_i32_1 = arith.constant 0 : i32
    return %c0_i32, %c0_i32_0 : i32, i32
  }
  func.func @transform_3(%arg0: i32) -> (i32, i32) {
    %c0_i32 = arith.constant 0 : i32
    %c0_i32_0 = arith.constant 0 : i32
    %c0_i32_1 = arith.constant 0 : i32
    return %c0_i32, %c0_i32_0 : i32, i32
  }
  func.func @transform_4(%arg0: i32) -> (i32, i32) {
    %c0_i32 = arith.constant 0 : i32
    %c0_i32_0 = arith.constant 0 : i32
    %c0_i32_1 = arith.constant 0 : i32
    return %c0_i32, %c0_i32_0 : i32, i32
  }
  func.func @transform_5(%arg0: i32) -> (i32, i32) {
    %c0_i32 = arith.constant 0 : i32
    %c0_i32_0 = arith.constant 0 : i32
    return %arg0, %c0_i32 : i32, i32
  }
}

module attributes {stable_mosaic.version = 11 : i64} {
  func.func @_encoder_head_kernel(%arg0: i32, %arg1: memref<8x32xf32, #tpu.memory_space<vmem>>, %arg2: memref<32x128xbf16, #tpu.memory_space<vmem>>, %arg3: memref<1x128xf32, #tpu.memory_space<vmem>>, %arg4: memref<128x128xbf16, #tpu.memory_space<vmem>>, %arg5: memref<1x128xf32, #tpu.memory_space<vmem>>, %arg6: memref<8x128xf32, #tpu.memory_space<vmem>>) attributes {dimension_semantics = [#tpu.dimension_semantics<parallel>], iteration_bounds = array<i64: 2>, scalar_prefetch = 0 : i64, scratch_operands = 0 : i64, tpu.core_type = #tpu.core_type<tc>, window_params = [{transform_indices = @transform_0, window_bounds = array<i64: 8, 32>}, {pipeline_mode = #tpu.pipeline_mode<synchronous>, transform_indices = @transform_1, window_bounds = array<i64: 32, 128>}, {pipeline_mode = #tpu.pipeline_mode<synchronous>, transform_indices = @transform_2, window_bounds = array<i64: 1, 128>}, {pipeline_mode = #tpu.pipeline_mode<synchronous>, transform_indices = @transform_3, window_bounds = array<i64: 128, 128>}, {pipeline_mode = #tpu.pipeline_mode<synchronous>, transform_indices = @transform_4, window_bounds = array<i64: 1, 128>}, {transform_indices = @transform_5, window_bounds = array<i64: 8, 128>}]} {
    %c0 = arith.constant 0 : index
    %c0_0 = arith.constant 0 : index
    %0 = vector.load %arg2[%c0, %c0_0] : memref<32x128xbf16, #tpu.memory_space<vmem>>, vector<32x128xbf16>
    %c0_1 = arith.constant 0 : index
    %c0_2 = arith.constant 0 : index
    %1 = vector.load %arg4[%c0_1, %c0_2] : memref<128x128xbf16, #tpu.memory_space<vmem>>, vector<128x128xbf16>
    %c0_3 = arith.constant 0 : index
    %c0_4 = arith.constant 0 : index
    %2 = vector.load %arg3[%c0_3, %c0_4] : memref<1x128xf32, #tpu.memory_space<vmem>>, vector<1x128xf32>
    %c0_5 = arith.constant 0 : index
    %c0_6 = arith.constant 0 : index
    %3 = vector.load %arg5[%c0_5, %c0_6] : memref<1x128xf32, #tpu.memory_space<vmem>>, vector<1x128xf32>
    %c0_7 = arith.constant 0 : index
    %c0_8 = arith.constant 0 : index
    %4 = vector.load %arg1[%c0_7, %c0_8] : memref<8x32xf32, #tpu.memory_space<vmem>>, vector<8x32xf32>
    %5 = arith.truncf %4 : vector<8x32xf32> to vector<8x32xbf16>
    %cst = arith.constant dense<0.000000e+00> : vector<8x128xf32>
    %6 = tpu.matmul %5, %0, %cst {dimension_numbers = #tpu.dot_dimension_numbers<[1], [0], [0], [1], [0, 0, 1, 1], [], []>} : vector<8x32xbf16>, vector<32x128xbf16>, vector<8x128xf32> -> vector<8x128xf32>
    %7 = vector.broadcast %2 : vector<1x128xf32> to vector<8x128xf32>
    %8 = arith.addf %6, %7 : vector<8x128xf32>
    %9 = math.tanh %8 : vector<8x128xf32>
    %10 = arith.truncf %9 : vector<8x128xf32> to vector<8x128xbf16>
    %cst_9 = arith.constant dense<0.000000e+00> : vector<8x128xf32>
    %11 = tpu.matmul %10, %1, %cst_9 {dimension_numbers = #tpu.dot_dimension_numbers<[1], [0], [0], [1], [0, 0, 1, 1], [], []>} : vector<8x128xbf16>, vector<128x128xbf16>, vector<8x128xf32> -> vector<8x128xf32>
    %12 = vector.broadcast %3 : vector<1x128xf32> to vector<8x128xf32>
    %13 = arith.addf %11, %12 : vector<8x128xf32>
    %c0_10 = arith.constant 0 : index
    %c0_11 = arith.constant 0 : index
    %14 = vector.load %arg6[%c0_10, %c0_11] : memref<8x128xf32, #tpu.memory_space<vmem>>, vector<8x128xf32>
    tpu.vector_store %arg6[%c0_10, %c0_11], %13 {strides = array<i32>} : memref<8x128xf32, #tpu.memory_space<vmem>>, vector<8x128xf32>,
    return
  }
  func.func @transform_0(%arg0: i32) -> (i32, i32) {
    %c0_i32 = arith.constant 0 : i32
    %c0_i32_0 = arith.constant 0 : i32
    return %arg0, %c0_i32 : i32, i32
  }
  func.func @transform_1(%arg0: i32) -> (i32, i32) {
    %c0_i32 = arith.constant 0 : i32
    %c0_i32_0 = arith.constant 0 : i32
    %c0_i32_1 = arith.constant 0 : i32
    return %c0_i32, %c0_i32_0 : i32, i32
  }
  func.func @transform_2(%arg0: i32) -> (i32, i32) {
    %c0_i32 = arith.constant 0 : i32
    %c0_i32_0 = arith.constant 0 : i32
    %c0_i32_1 = arith.constant 0 : i32
    return %c0_i32, %c0_i32_0 : i32, i32
  }
  func.func @transform_3(%arg0: i32) -> (i32, i32) {
    %c0_i32 = arith.constant 0 : i32
    %c0_i32_0 = arith.constant 0 : i32
    %c0_i32_1 = arith.constant 0 : i32
    return %c0_i32, %c0_i32_0 : i32, i32
  }
  func.func @transform_4(%arg0: i32) -> (i32, i32) {
    %c0_i32 = arith.constant 0 : i32
    %c0_i32_0 = arith.constant 0 : i32
    %c0_i32_1 = arith.constant 0 : i32
    return %c0_i32, %c0_i32_0 : i32, i32
  }
  func.func @transform_5(%arg0: i32) -> (i32, i32) {
    %c0_i32 = arith.constant 0 : i32
    %c0_i32_0 = arith.constant 0 : i32
    return %arg0, %c0_i32 : i32, i32
  }
}

</mosaic_0001>

<bundles_post_ra>
// kernel: tpu_custom_call.1
= control target key start
LH: loop header
LB: loop body
LE: loop exit
PB: predicated region body
PF: predicated region fallthrough
CT: control target
= control target key end

     0   :  { %10 = vsyncpa [#allocation3], 0  ;;  %s1143_s0 = inlined_call_operand.hbm [shape: f32[16,32], index: 0, kind: input, shape index: {}]   ;;  %s1144_s1 = inlined_call_operand.hbm [shape: bf16[32,128], index: 1, kind: input, shape index: {}]   ;;  %s1145_s2 = inlined_call_operand.vmem [shape: f32[1,128], index: 2, kind: input, shape index: {}]   ;;  %s1146_s3 = inlined_call_operand.hbm [shape: bf16[128,128], index: 3, kind: input, shape index: {}]   ;;  %s1147_s4 = inlined_call_operand.vmem [shape: f32[1,128], index: 4, kind: input, shape index: {}]   ;;  %s1148_s5 = inlined_call_operand.hbm [shape: f32[16,128], index: 5, kind: output, shape index: {}]  }
   0x1   :  { %12 = vsyncpa [#allocation3 + $0x1], 0 }
   0x2   :  { %13 = vsyncpa [#allocation6], 0 }
   0x3   :  { %14 = vsyncpa [#allocation4], 0 }
   0x4   :  { %16 = vsyncpa [#allocation4 + $0x1], 0  ;;  %s904_s18 = smov 0   ;;  %s906_s19 = smov 0  }
   0x5   :  { %s908_s20 = smov 0   ;;  %s910_s21 = smov 0  }
   0x6 LB: > { %s925_s22 = sadd.s32 4294967295, %s864_s21   ;;  %s556_s23 = sadd.s32 4294967294, %s864_s21   ;;  %s864_s21 = sphi %s910_s21, %s1168_s21   ;;  %s860_s20 = sphi %s908_s20, %s1167_s20   ;;  %s856_s19 = sphi %s906_s19, %s1166_s19   ;;  %s852_s18 = sphi %s904_s18, %s1165_s18  }
   0x7   : > { %p42_p0 = scmp.ne.s32.totalorder %s856_s19, %s852_s18  ;;  %p1149_p1 = scmp.eq.s32.totalorder %s925_s22, 0 }
   0x8   : > { %p156_p3 = scmp.eq.s32.totalorder %s556_s23, 1  ;;  %p557_p5 = scmp.ge.s32.totalorder %s864_s21, 1 }
   0x9   : > { %p934_p4 = por %p1149_p1, %p42_p0  ;;  %p163_p7 = scmp.lt.s32.totalorder %s864_s21, 3 }
   0xa   : > { %p939_p6 = por %p156_p3, %p42_p0  ;;  %s866_s27 = smov [#allocation5]  }
   0xb   : > { %s1152_s24 = scalar_select %p934_p4, 1, 0 }
   0xc   : > { %s1153_s25 = scalar_select %p939_p6, 1, 0 }
   0xd   : > { %p944_p8 = pnand %p557_p5, %p163_p7  ;;  %s175_s28 = sshll.u32 %s866_s27, 4  ;;  %s948_s28 = int_to_ptr.vmem [resolvable:$true] %s175_s28 }
   0xe   : > { %s867_s30 = smov [#allocation7]   ;;  %s708_s9 = scalar_lea.hbm %s1144_s1, 256 }
   0xf   : > { %p637_p9 = pneg %p944_p8  ;;  %s191_s6 = sshll.u32 %s867_s30, 4  ;;  %s959_s6 = int_to_ptr.vmem [resolvable:$true] %s191_s6 }
  0x10   : > { %p709_p12 = scmp.ne.s32.totalorder %s1144_s1, %s708_s9  ;;  %p715_p5 = scmp.lt.u32.totalorder %s708_s9, %s1144_s1 }
  0x11   : > { %p955_p11 = pnand %p637_p9, %p1149_p1 }
  0x13   : > { %p710_p13 = pneg %p955_p11 }
  0x15   : > { %p711_p0 = pnand %p710_p13, %p709_p12 }
  0x17   : > { %p712_p3 = pneg %p711_p0 }
  0x19   : > { %p717_p7 = pnand %p715_p5, %p712_p3 }
  0x1b   : > { %720 = shalt.err (!%p717_p7)
}
  0x1c   : > { %s721_s14 = scalar_lea.vmem %s948_s28, 256  ;;  %p729_p2 = scmp.lt.s32.totalorder %s948_s28, %s948_s28 }
  0x1d   : > { %p722_p9 = scmp.ne.s32.totalorder %s948_s28, %s721_s14  ;;  %p730_p12 = scmp.lt.s32.totalorder %s721_s14, %s721_s14 }
  0x1f   : > { %p724_p10 = pnand %p722_p9, %p710_p13  ;;  %p731_p0 = por %p730_p12, %p729_p2 }
  0x21   : > { %p725_p1 = pneg %p724_p10 }
  0x23   : > { %p732_p6 = pnand %p731_p0, %p725_p1 }
  0x25   : > { %735 = shalt.err (!%p732_p6)
}
  0x26   : > { %s868_s15 = smov 64   ;;  %s869_s16 = smov 4  }
  0x27   : > { %640 = dma.hbm_to_vmem [thread:$0]  (!%p955_p11), %s1144_s1, 256, %s948_s28, [#allocation6], %s868_s15, %s868_s15, %s869_s16  }
  0x28   : > { %s736_s7 = scalar_lea.hbm %s1146_s3, 1024 }
  0x29   : > { %p737_p2 = scmp.ne.s32.totalorder %s1146_s3, %s736_s7  ;;  %p743_p10 = scmp.lt.u32.totalorder %s736_s7, %s1146_s3 }
  0x2b   : > { %p739_p1 = pnand %p737_p2, %p710_p13 }
  0x2d   : > { %p740_p6 = pneg %p739_p1 }
  0x2f   : > { %p745_p3 = pnand %p743_p10, %p740_p6 }
  0x31   : > { %748 = shalt.err (!%p745_p3)
}
  0x32   : > { %s749_s28 = scalar_lea.vmem %s959_s6, 1024  ;;  %p757_p12 = scmp.lt.s32.totalorder %s959_s6, %s959_s6 }
  0x33   : > { %p750_p5 = scmp.ne.s32.totalorder %s959_s6, %s749_s28  ;;  %p758_p0 = scmp.lt.s32.totalorder %s749_s28, %s749_s28 }
  0x35   : > { %p752_p7 = pnand %p750_p5, %p710_p13  ;;  %p759_p2 = por %p758_p0, %p757_p12 }
  0x37   : > { %p753_p9 = pneg %p752_p7 }
  0x39   : > { %p760_p1 = pnand %p759_p2, %p753_p9 }
  0x3b   : > { %763 = shalt.err (!%p760_p1)
}
  0x3c   : > { %643 = dma.hbm_to_vmem [thread:$0]  (!%p955_p11), %s1146_s3, 1024, %s959_s6, [#allocation6], %s868_s15, %s868_s15, %s869_s16  }
  0x3d   : > { %s1014_s14 = sadd.s32 1, %s864_s21   ;;  %s29_s29 = sadd.s32 1, %s860_s20 }
  0x3e   : > { %s26_s17 = ssub.s32 %s864_s21, %s1014_s14  ;;  %p36_p13 = scmp.ne.s32.totalorder %s860_s20, %s856_s19 }
  0x3f   : > { %p27_p6 = scmp.eq.s32.totalorder %s26_s17, 0  ;;  %p37_p10 = scmp.eq.s32.totalorder %s864_s21, 0 }
  0x40   : > { %p1156_p3 = scmp.eq.s32.totalorder %s925_s22, 1  ;;  %p654_p7 = scmp.lt.s32.totalorder %s864_s21, 2 }
  0x41   : > { %s1030_s27 = scalar_select %p27_p6, %s860_s20, %s29_s29  }
  0x42   : > { %p1024_p5 = por %p1156_p3, %p36_p13  ;;  %p38_p9 = por %p37_p10, %p36_p13 }
  0x43   : > { %s208_s30 = sand.u32 1, %s860_s20   ;;  %s562_s6 = sshll.u32 %s864_s21, 7 }
  0x44   : > { %s1157_s23 = scalar_select %p1024_p5, 1, 0 }
  0x45   : > { %s561_s7 = sshll.u32 %s208_s30, 3  ;;  %s1037_s8 = scalar_lea.hbm %s1143_s0, %s562_s6 }
  0x46   : > { %s212_s9 = scalar_lea.vmem [#allocation2], %s561_s7  ;;  %p1041_p11 = pnand %p654_p7, %p38_p9 }
  0x47   : > { %s219_s10 = sshll.u32 %s212_s9, 4  ;;  %s209_s28 = scalar_lea.sflag [#allocation3], %s208_s30  ;;  %s1039_s10 = int_to_ptr.vmem [resolvable:$true] %s219_s10 }
  0x48   : > { %s764_s12 = scalar_lea.hbm %s1037_s8, 128  ;;  %p766_p0 = pneg %p1041_p11 }
  0x49   : > { %p765_p12 = scmp.ne.s32.totalorder %s1037_s8, %s764_s12  ;;  %s769_s17 = scalar_lea.hbm %s1143_s0, 256 }
  0x4a   : > { %p770_p13 = scmp.lt.u32.totalorder %s1037_s8, %s1143_s0  ;;  %p771_p6 = scmp.lt.u32.totalorder %s769_s17, %s764_s12 }
  0x4b   : > { %p767_p2 = pnand %p766_p0, %p765_p12  ;;  %p773_p3 = scmp.lt.u32.totalorder %s764_s12, %s1037_s8 }
  0x4c   : > { %p772_p10 = por %p771_p6, %p770_p13 }
  0x4d   : > { %p768_p1 = pneg %p767_p2 }
  0x4e   : > { %p774_p7 = por %p773_p3, %p772_p10 }
  0x50   : > { %p775_p9 = pnand %p774_p7, %p768_p1 }
  0x52   : > { %778 = shalt.err (!%p775_p9)
}
  0x53   : > { %s779_s30 = scalar_lea.vmem %s1039_s10, 128  ;;  %s870_s15 = smov [#allocation2]  }
  0x54   : > { %p780_p12 = scmp.ne.s32.totalorder %s1039_s10, %s779_s30  ;;  %s784_s16 = sshll.u32 %s870_s15, 4  ;;  %s785_s16 = int_to_ptr.vmem [resolvable:$false] %s784_s16 }
  0x55   : > { %s786_s9 = scalar_lea.vmem %s785_s16, 256  ;;  %p787_p4 = scmp.lt.s32.totalorder %s1039_s10, %s785_s16 }
  0x56   : > { %p782_p2 = pnand %p780_p12, %p766_p0  ;;  %p788_p13 = scmp.lt.s32.totalorder %s786_s9, %s779_s30 }
  0x58   : > { %p783_p5 = pneg %p782_p2  ;;  %p789_p6 = por %p788_p13, %p787_p4 }
  0x5a   : > { %p790_p10 = pnand %p789_p6, %p783_p5 }
  0x5c   : > { %793 = shalt.err (!%p790_p10)
}
  0x5d   : > { %647 = dma.hbm_to_vmem [thread:$0]  (!%p1041_p11), %s1037_s8, 128, %s1039_s10, %s209_s28  }
  0x5e   : > { %228 = sbr.rel (%p944_p8) target bundleno = 570 (0x23a), region = 40  ;;  %s1073_s12 = sand.u32 (!%p944_p8), 1, %s856_s19  }
  0x5f   : > { %s564_s13 = sshll.u32 (!%p944_p8), %s1073_s12, 3  ;;  %s231_s29 = scalar_lea.sflag (!%p944_p8), [#allocation3], %s1073_s12 }
  0x60   : > { %s234_s17 = scalar_lea.vmem (!%p944_p8), [#allocation2], %s564_s13  ;;  %p1159_p4 = scmp.ne.s32.totalorder (!%p944_p8), %s1152_s24, 0 }
  0x65   : > { %839 = dma.done.wait (%p1159_p4), %s231_s29, 128  }
  0x66   : > { %841 = vsyncadd (%p1159_p4), %s231_s29, 4294967168  ;;  %p1160_p5 = scmp.eq.s32.totalorder %s925_s22, 0 }
  0x68   : > { %843 = dma.done.wait (%p1160_p5), [#allocation6], 1280   ;;  %p1161_p8 = pmov %p1160_p5 }
  0x69   : > { %v871_v0 = vmov 0.0   ;;  %vm872_vm0 = vmmov 0   ;;  %v696_v1 = vld [vmem:[#allocation5] sm:$0xff]   ;;  %v697_v2 = vld [vmem:[#allocation5 + $0x8] sm:$0xff]   ;;  %v292_v3 = vld [vmem:[%s234_s17] sm:$0xff]  ;;  %vm312_vm1 = vcmask 261120  }
  0x6a   : > { %845 = vsyncadd (%p1161_p8), [#allocation6], 4294966016  ;;  %597 = vmatprep.subr.bf16.mxu0 %v871_v0  ;;  %601 = vmatprep.mubr.msk.bf16.mxu0 %vm872_vm0, %v871_v0  ;;  %v698_v4 = vld [vmem:[#allocation7] sm:$0xff]   ;;  %v293_v5 = vpack.c.bf16 %v292_v3, %v292_v3  ;;  %v699_v6 = vld [vmem:[#allocation7 + $0x8] sm:$0xff]   ;;  %s582_s11 = sshll.u32 %s925_s22, 7  ;;  %s268_s28 = scalar_lea.vmem [#allocation8], %s564_s13 }
  0x6b   : > { %605 = vmatprep.subr.bf16.mxu1 %v871_v0  ;;  %621 = vmatprep.mubr.msk.bf16.mxu1 %vm872_vm0, %v871_v0  ;;  %v700_v7 = vld [vmem:[#allocation7 + $0x10] sm:$0xff]   ;;  %v701_v8 = vld [vmem:[#allocation7 + $0x18] sm:$0xff]   ;;  %v702_v9 = vld [vmem:[#allocation7 + $0x20] sm:$0xff]   ;;  %s467_s7 = sshll.u32 %s268_s28, 4  ;;  %s1099_s15 = scalar_lea.hbm %s1148_s5, %s582_s11  ;;  %s1101_s7 = int_to_ptr.vmem [resolvable:$true] %s467_s7 }
  0x6c   : > { %598 = vmatpush3.bf16.msra.mxu0 %v696_v1  ;;  %606 = vmatpush3.bf16.msra.mxu1 %v698_v4  ;;  %v703_v10 = vld [vmem:[#allocation7 + $0x28] sm:$0xff]   ;;  %v704_v11 = vld [vmem:[#allocation7 + $0x30] sm:$0xff]   ;;  %v705_v12 = vld [vmem:[#allocation7 + $0x38] sm:$0xff]   ;;  %s454_s22 = scalar_lea.sflag [#allocation4], %s1073_s12  ;;  %s794_s16 = scalar_lea.vmem %s1101_s7, 128 }
  0x6d   : > { %599 = vmatprep.subr.bf16.mxu0 %v871_v0  ;;  %607 = vmatprep.subr.bf16.mxu1 %v871_v0  ;;  %v568_v13 = vld [vmem:[%s1145_s2] ss:$0 sm:$0xff]  ;;  %p795_p11 = scmp.ne.s32.totalorder %s1101_s7, %s794_s16  ;;  %p1162_p0 = scmp.ne.s32.totalorder %s1157_s23, 0 }
  0x6e   : > { %v572_v21 = vld [vmem:[%s1147_s4] ss:$0 sm:$0xff]  ;;  %s873_s9 = smov [#allocation8]  }
  0x6f   : > { %p796_p1 = pnand %p795_p11, %p1162_p0  ;;  %s798_s13 = sshll.u32 %s873_s9, 4  ;;  %s799_s13 = int_to_ptr.vmem [resolvable:$false] %s798_s13 }
  0x70   : > { %600 = vmatpush3.bf16.msra.mxu0 %v697_v2  ;;  %608 = vmatpush3.bf16.msra.mxu1 %v699_v6  ;;  %s800_s29 = scalar_lea.vmem %s799_s13, 256  ;;  %p801_p7 = scmp.lt.s32.totalorder %s1101_s7, %s799_s13 }
  0x71   : > { %609 = vmatprep.subr.bf16.mxu1 %v871_v0  ;;  %p797_p3 = pneg %p796_p1  ;;  %p802_p9 = scmp.lt.s32.totalorder %s800_s29, %s794_s16 }
  0x73   : > { %602 = vmatmul.mubr.msk.bf16.vlgmr.msra.gmra.mrb[0].mxu0 %vm312_vm1, %v293_v5  ;;  %p803_p12 = por %p802_p9, %p801_p7 }
  0x74   : > { %610 = vmatpush3.bf16.msra.mxu1 %v700_v7 }
  0x75   : > { %611 = vmatprep.subr.bf16.mxu1 %v871_v0  ;;  %p804_p2 = pnand %p803_p12, %p797_p3 }
  0x78   : > { %612 = vmatpush3.bf16.msra.mxu1 %v701_v8 }
  0x79   : > { %613 = vmatprep.subr.bf16.mxu1 %v871_v0 }
  0x7c   : > { %614 = vmatpush3.bf16.msra.mxu1 %v702_v9 }
  0x7d   : > { %615 = vmatprep.subr.bf16.mxu1 %v871_v0 }
  0x80   : > { %616 = vmatpush3.bf16.msra.mxu1 %v703_v10 }
  0x81   : > { %617 = vmatprep.subr.bf16.mxu1 %v871_v0 }
  0x84   : > { %618 = vmatpush3.bf16.msra.mxu1 %v704_v11 }
  0x85   : > { %619 = vmatprep.subr.bf16.mxu1 %v871_v0 }
  0x88   : > { %620 = vmatpush3.bf16.msra.mxu1 %v705_v12 }
 0x146   : > { %v350_v14 = vpop.f32.mrb[0].mxu0 }
 0x147   : > { %v351_v15 = vadd.f32 %v568_v13, %v350_v14  ;;  %v603_v16 = vpop.f32.mrb[1].mxu0 }
 0x148   : > { %v353_v17 = vpop.f32.mrb[2].mxu0 }
 0x149   : > { %706 = vtanh.f32 %v351_v15  ;;  %v604_v18 = vpop.f32.mrb[3].mxu0 }
 0x153   : > { %v707_v19 = vpop.eup %706 }
 0x154   : > { %v357_v20 = vpack.c.bf16 %v707_v19, %v707_v19 }
 0x156   : > { %622 = vmatmul.mubr.bf16.vlgmr.msra.gmra.mrb[0].mxu1 %v357_v20 }
 0x229   : > { %v446_v22 = vpop.f32.mrb[0].mxu1 }
 0x22a   : > { %v447_v23 = vadd.f32 %v572_v21, %v446_v22  ;;  %v623_v24 = vpop.f32.mrb[1].mxu1 }
 0x22b   : > { %v449_v25 = vpop.f32.mrb[2].mxu1 }
 0x22c   : > { %452 = vst [vmem:[%s268_s28] sm:$0xff] %v447_v23  ;;  %v624_v26 = vpop.f32.mrb[3].mxu1 }
 0x22d   : > { %807 = shalt.err (!%p804_p2)
}
 0x22e   : > { %s808_s12 = scalar_lea.hbm %s1099_s15, 128  ;;  %s812_s26 = scalar_lea.hbm %s1148_s5, 256 }
 0x22f   : > { %p809_p13 = scmp.ne.s32.totalorder %s1099_s15, %s808_s12  ;;  %p813_p4 = scmp.lt.u32.totalorder %s1099_s15, %s1148_s5 }
 0x230   : > { %p814_p5 = scmp.lt.u32.totalorder %s812_s26, %s808_s12  ;;  %p816_p11 = scmp.lt.u32.totalorder %s808_s12, %s1099_s15 }
 0x231   : > { %p810_p6 = pnand %p809_p13, %p1162_p0 }
 0x232   : > { %p815_p8 = por %p814_p5, %p813_p4 }
 0x233   : > { %p811_p10 = pneg %p810_p6 }
 0x234   : > { %p817_p1 = por %p816_p11, %p815_p8 }
 0x236   : > { %p818_p3 = pnand %p817_p1, %p811_p10 }
 0x238   : > { %821 = shalt.err (!%p818_p3)
}
 0x239   : > { %635 = dma.vmem_to_hbm [thread:$0]  (%p1162_p0), %s1101_s7, 128, %s1099_s15, %s454_s22  }
 0x23a PF: > { %s479_s11 = sand.u32 1, %s852_s18   ;;  %p1163_p7 = scmp.ne.s32.totalorder %s1153_s25, 0 }
 0x23b   : > { %p1164_p9 = scmp.ge.s32.totalorder %s864_s21, 2  ;;  %s480_s28 = scalar_lea.sflag [#allocation4], %s479_s11 }
 0x23d   : > { %p649_p12 = pnand %p1164_p9, %p1163_p7 }
 0x23f   : > { %847 = dma.done.wait (!%p649_p12), %s480_s28, 128  }
 0x240   : > { %849 = vsyncadd (!%p649_p12), %s480_s28, 4294967168  ;;  %p19_p2 = scmp.ge.s32.totalorder %s1014_s14, 4   ;;  %s1165_s18 = smov %s856_s19 }
 0x241   : > { %s1166_s19 = smov %s860_s20  ;;  %s1167_s20 = smov %s1030_s27 }
 0x242   : > { %s1168_s21 = smov %s1014_s14  ;;  %21 = sbr.rel (!%p19_p2) target bundleno = 6 (0x6), region = 93 }
 0x249   :  { %485 = vsyncpa [#allocation3], 1 }
 0x24a   :  { %487 = vsyncpa [#allocation3 + $0x1], 1 }
 0x24b   :  { %488 = vsyncpa [#allocation6], 1 }
 0x24c   :  { %489 = vsyncpa [#allocation4], 1 }
 0x24d   :  { %491 = vsyncpa [#allocation4 + $0x1], 1 }

// kernel: tpu_custom_call.1
= control target key start
LH: loop header
LB: loop body
LE: loop exit
PB: predicated region body
PF: predicated region fallthrough
CT: control target
= control target key end

     0   :  { %10 = vsyncpa [#allocation3], 0  ;;  %s1143_s0 = inlined_call_operand.hbm [shape: f32[16,32], index: 0, kind: input, shape index: {}]   ;;  %s1144_s1 = inlined_call_operand.hbm [shape: bf16[32,128], index: 1, kind: input, shape index: {}]   ;;  %s1145_s2 = inlined_call_operand.vmem [shape: f32[1,128], index: 2, kind: input, shape index: {}]   ;;  %s1146_s3 = inlined_call_operand.hbm [shape: bf16[128,128], index: 3, kind: input, shape index: {}]   ;;  %s1147_s4 = inlined_call_operand.vmem [shape: f32[1,128], index: 4, kind: input, shape index: {}]   ;;  %s1148_s5 = inlined_call_operand.hbm [shape: f32[16,128], index: 5, kind: output, shape index: {}]  }
   0x1   :  { %12 = vsyncpa [#allocation3 + $0x1], 0 }
   0x2   :  { %13 = vsyncpa [#allocation6], 0 }
   0x3   :  { %14 = vsyncpa [#allocation4], 0 }
   0x4   :  { %16 = vsyncpa [#allocation4 + $0x1], 0  ;;  %s904_s18 = smov 0   ;;  %s906_s19 = smov 0  }
   0x5   :  { %s908_s20 = smov 0   ;;  %s910_s21 = smov 0  }
   0x6 LB: > { %s925_s22 = sadd.s32 4294967295, %s864_s21   ;;  %s556_s23 = sadd.s32 4294967294, %s864_s21   ;;  %s864_s21 = sphi %s910_s21, %s1168_s21   ;;  %s860_s20 = sphi %s908_s20, %s1167_s20   ;;  %s856_s19 = sphi %s906_s19, %s1166_s19   ;;  %s852_s18 = sphi %s904_s18, %s1165_s18  }
   0x7   : > { %p42_p0 = scmp.ne.s32.totalorder %s856_s19, %s852_s18  ;;  %p1149_p1 = scmp.eq.s32.totalorder %s925_s22, 0 }
   0x8   : > { %p156_p3 = scmp.eq.s32.totalorder %s556_s23, 1  ;;  %p557_p5 = scmp.ge.s32.totalorder %s864_s21, 1 }
   0x9   : > { %p934_p4 = por %p1149_p1, %p42_p0  ;;  %p163_p7 = scmp.lt.s32.totalorder %s864_s21, 3 }
   0xa   : > { %p939_p6 = por %p156_p3, %p42_p0  ;;  %s866_s27 = smov [#allocation5]  }
   0xb   : > { %s1152_s24 = scalar_select %p934_p4, 1, 0 }
   0xc   : > { %s1153_s25 = scalar_select %p939_p6, 1, 0 }
   0xd   : > { %p944_p8 = pnand %p557_p5, %p163_p7  ;;  %s175_s28 = sshll.u32 %s866_s27, 4  ;;  %s948_s28 = int_to_ptr.vmem [resolvable:$true] %s175_s28 }
   0xe   : > { %s867_s30 = smov [#allocation7]   ;;  %s708_s9 = scalar_lea.hbm %s1144_s1, 256 }
   0xf   : > { %p637_p9 = pneg %p944_p8  ;;  %s191_s6 = sshll.u32 %s867_s30, 4  ;;  %s959_s6 = int_to_ptr.vmem [resolvable:$true] %s191_s6 }
  0x10   : > { %p709_p12 = scmp.ne.s32.totalorder %s1144_s1, %s708_s9  ;;  %p715_p5 = scmp.lt.u32.totalorder %s708_s9, %s1144_s1 }
  0x11   : > { %p955_p11 = pnand %p637_p9, %p1149_p1 }
  0x13   : > { %p710_p13 = pneg %p955_p11 }
  0x15   : > { %p711_p0 = pnand %p710_p13, %p709_p12 }
  0x17   : > { %p712_p3 = pneg %p711_p0 }
  0x19   : > { %p717_p7 = pnand %p715_p5, %p712_p3 }
  0x1b   : > { %720 = shalt.err (!%p717_p7)
}
  0x1c   : > { %s721_s14 = scalar_lea.vmem %s948_s28, 256  ;;  %p729_p2 = scmp.lt.s32.totalorder %s948_s28, %s948_s28 }
  0x1d   : > { %p722_p9 = scmp.ne.s32.totalorder %s948_s28, %s721_s14  ;;  %p730_p12 = scmp.lt.s32.totalorder %s721_s14, %s721_s14 }
  0x1f   : > { %p724_p10 = pnand %p722_p9, %p710_p13  ;;  %p731_p0 = por %p730_p12, %p729_p2 }
  0x21   : > { %p725_p1 = pneg %p724_p10 }
  0x23   : > { %p732_p6 = pnand %p731_p0, %p725_p1 }
  0x25   : > { %735 = shalt.err (!%p732_p6)
}
  0x26   : > { %s868_s15 = smov 64   ;;  %s869_s16 = smov 4  }
  0x27   : > { %640 = dma.hbm_to_vmem [thread:$0]  (!%p955_p11), %s1144_s1, 256, %s948_s28, [#allocation6], %s868_s15, %s868_s15, %s869_s16  }
  0x28   : > { %s736_s7 = scalar_lea.hbm %s1146_s3, 1024 }
  0x29   : > { %p737_p2 = scmp.ne.s32.totalorder %s1146_s3, %s736_s7  ;;  %p743_p10 = scmp.lt.u32.totalorder %s736_s7, %s1146_s3 }
  0x2b   : > { %p739_p1 = pnand %p737_p2, %p710_p13 }
  0x2d   : > { %p740_p6 = pneg %p739_p1 }
  0x2f   : > { %p745_p3 = pnand %p743_p10, %p740_p6 }
  0x31   : > { %748 = shalt.err (!%p745_p3)
}
  0x32   : > { %s749_s28 = scalar_lea.vmem %s959_s6, 1024  ;;  %p757_p12 = scmp.lt.s32.totalorder %s959_s6, %s959_s6 }
  0x33   : > { %p750_p5 = scmp.ne.s32.totalorder %s959_s6, %s749_s28  ;;  %p758_p0 = scmp.lt.s32.totalorder %s749_s28, %s749_s28 }
  0x35   : > { %p752_p7 = pnand %p750_p5, %p710_p13  ;;  %p759_p2 = por %p758_p0, %p757_p12 }
  0x37   : > { %p753_p9 = pneg %p752_p7 }
  0x39   : > { %p760_p1 = pnand %p759_p2, %p753_p9 }
  0x3b   : > { %763 = shalt.err (!%p760_p1)
}
  0x3c   : > { %643 = dma.hbm_to_vmem [thread:$0]  (!%p955_p11), %s1146_s3, 1024, %s959_s6, [#allocation6], %s868_s15, %s868_s15, %s869_s16  }
  0x3d   : > { %s1014_s14 = sadd.s32 1, %s864_s21   ;;  %s29_s29 = sadd.s32 1, %s860_s20 }
  0x3e   : > { %s26_s17 = ssub.s32 %s864_s21, %s1014_s14  ;;  %p36_p13 = scmp.ne.s32.totalorder %s860_s20, %s856_s19 }
  0x3f   : > { %p27_p6 = scmp.eq.s32.totalorder %s26_s17, 0  ;;  %p37_p10 = scmp.eq.s32.totalorder %s864_s21, 0 }
  0x40   : > { %p1156_p3 = scmp.eq.s32.totalorder %s925_s22, 1  ;;  %p654_p7 = scmp.lt.s32.totalorder %s864_s21, 2 }
  0x41   : > { %s1030_s27 = scalar_select %p27_p6, %s860_s20, %s29_s29  }
  0x42   : > { %p1024_p5 = por %p1156_p3, %p36_p13  ;;  %p38_p9 = por %p37_p10, %p36_p13 }
  0x43   : > { %s208_s30 = sand.u32 1, %s860_s20   ;;  %s562_s6 = sshll.u32 %s864_s21, 7 }
  0x44   : > { %s1157_s23 = scalar_select %p1024_p5, 1, 0 }
  0x45   : > { %s561_s7 = sshll.u32 %s208_s30, 3  ;;  %s1037_s8 = scalar_lea.hbm %s1143_s0, %s562_s6 }
  0x46   : > { %s212_s9 = scalar_lea.vmem [#allocation2], %s561_s7  ;;  %p1041_p11 = pnand %p654_p7, %p38_p9 }
  0x47   : > { %s219_s10 = sshll.u32 %s212_s9, 4  ;;  %s209_s28 = scalar_lea.sflag [#allocation3], %s208_s30  ;;  %s1039_s10 = int_to_ptr.vmem [resolvable:$true] %s219_s10 }
  0x48   : > { %s764_s12 = scalar_lea.hbm %s1037_s8, 128  ;;  %p766_p0 = pneg %p1041_p11 }
  0x49   : > { %p765_p12 = scmp.ne.s32.totalorder %s1037_s8, %s764_s12  ;;  %s769_s17 = scalar_lea.hbm %s1143_s0, 256 }
  0x4a   : > { %p770_p13 = scmp.lt.u32.totalorder %s1037_s8, %s1143_s0  ;;  %p771_p6 = scmp.lt.u32.totalorder %s769_s17, %s764_s12 }
  0x4b   : > { %p767_p2 = pnand %p766_p0, %p765_p12  ;;  %p773_p3 = scmp.lt.u32.totalorder %s764_s12, %s1037_s8 }
  0x4c   : > { %p772_p10 = por %p771_p6, %p770_p13 }
  0x4d   : > { %p768_p1 = pneg %p767_p2 }
  0x4e   : > { %p774_p7 = por %p773_p3, %p772_p10 }
  0x50   : > { %p775_p9 = pnand %p774_p7, %p768_p1 }
  0x52   : > { %778 = shalt.err (!%p775_p9)
}
  0x53   : > { %s779_s30 = scalar_lea.vmem %s1039_s10, 128  ;;  %s870_s15 = smov [#allocation2]  }
  0x54   : > { %p780_p12 = scmp.ne.s32.totalorder %s1039_s10, %s779_s30  ;;  %s784_s16 = sshll.u32 %s870_s15, 4  ;;  %s785_s16 = int_to_ptr.vmem [resolvable:$false] %s784_s16 }
  0x55   : > { %s786_s9 = scalar_lea.vmem %s785_s16, 256  ;;  %p787_p4 = scmp.lt.s32.totalorder %s1039_s10, %s785_s16 }
  0x56   : > { %p782_p2 = pnand %p780_p12, %p766_p0  ;;  %p788_p13 = scmp.lt.s32.totalorder %s786_s9, %s779_s30 }
  0x58   : > { %p783_p5 = pneg %p782_p2  ;;  %p789_p6 = por %p788_p13, %p787_p4 }
  0x5a   : > { %p790_p10 = pnand %p789_p6, %p783_p5 }
  0x5c   : > { %793 = shalt.err (!%p790_p10)
}
  0x5d   : > { %647 = dma.hbm_to_vmem [thread:$0]  (!%p1041_p11), %s1037_s8, 128, %s1039_s10, %s209_s28  }
  0x5e   : > { %228 = sbr.rel (%p944_p8) target bundleno = 570 (0x23a), region = 40  ;;  %s1073_s12 = sand.u32 (!%p944_p8), 1, %s856_s19  }
  0x5f   : > { %s564_s13 = sshll.u32 (!%p944_p8), %s1073_s12, 3  ;;  %s231_s29 = scalar_lea.sflag (!%p944_p8), [#allocation3], %s1073_s12 }
  0x60   : > { %s234_s17 = scalar_lea.vmem (!%p944_p8), [#allocation2], %s564_s13  ;;  %p1159_p4 = scmp.ne.s32.totalorder (!%p944_p8), %s1152_s24, 0 }
  0x65   : > { %839 = dma.done.wait (%p1159_p4), %s231_s29, 128  }
  0x66   : > { %841 = vsyncadd (%p1159_p4), %s231_s29, 4294967168  ;;  %p1160_p5 = scmp.eq.s32.totalorder %s925_s22, 0 }
  0x68   : > { %843 = dma.done.wait (%p1160_p5), [#allocation6], 1280   ;;  %p1161_p8 = pmov %p1160_p5 }
  0x69   : > { %v871_v0 = vmov 0.0   ;;  %vm872_vm0 = vmmov 0   ;;  %v696_v1 = vld [vmem:[#allocation5] sm:$0xff]   ;;  %v697_v2 = vld [vmem:[#allocation5 + $0x8] sm:$0xff]   ;;  %v292_v3 = vld [vmem:[%s234_s17] sm:$0xff]  ;;  %vm312_vm1 = vcmask 261120  }
  0x6a   : > { %845 = vsyncadd (%p1161_p8), [#allocation6], 4294966016  ;;  %597 = vmatprep.subr.bf16.mxu0 %v871_v0  ;;  %601 = vmatprep.mubr.msk.bf16.mxu0 %vm872_vm0, %v871_v0  ;;  %v698_v4 = vld [vmem:[#allocation7] sm:$0xff]   ;;  %v293_v5 = vpack.c.bf16 %v292_v3, %v292_v3  ;;  %v699_v6 = vld [vmem:[#allocation7 + $0x8] sm:$0xff]   ;;  %s582_s11 = sshll.u32 %s925_s22, 7  ;;  %s268_s28 = scalar_lea.vmem [#allocation8], %s564_s13 }
  0x6b   : > { %605 = vmatprep.subr.bf16.mxu1 %v871_v0  ;;  %621 = vmatprep.mubr.msk.bf16.mxu1 %vm872_vm0, %v871_v0  ;;  %v700_v7 = vld [vmem:[#allocation7 + $0x10] sm:$0xff]   ;;  %v701_v8 = vld [vmem:[#allocation7 + $0x18] sm:$0xff]   ;;  %v702_v9 = vld [vmem:[#allocation7 + $0x20] sm:$0xff]   ;;  %s467_s7 = sshll.u32 %s268_s28, 4  ;;  %s1099_s15 = scalar_lea.hbm %s1148_s5, %s582_s11  ;;  %s1101_s7 = int_to_ptr.vmem [resolvable:$true] %s467_s7 }
  0x6c   : > { %598 = vmatpush3.bf16.msra.mxu0 %v696_v1  ;;  %606 = vmatpush3.bf16.msra.mxu1 %v698_v4  ;;  %v703_v10 = vld [vmem:[#allocation7 + $0x28] sm:$0xff]   ;;  %v704_v11 = vld [vmem:[#allocation7 + $0x30] sm:$0xff]   ;;  %v705_v12 = vld [vmem:[#allocation7 + $0x38] sm:$0xff]   ;;  %s454_s22 = scalar_lea.sflag [#allocation4], %s1073_s12  ;;  %s794_s16 = scalar_lea.vmem %s1101_s7, 128 }
  0x6d   : > { %599 = vmatprep.subr.bf16.mxu0 %v871_v0  ;;  %607 = vmatprep.subr.bf16.mxu1 %v871_v0  ;;  %v568_v13 = vld [vmem:[%s1145_s2] ss:$0 sm:$0xff]  ;;  %p795_p11 = scmp.ne.s32.totalorder %s1101_s7, %s794_s16  ;;  %p1162_p0 = scmp.ne.s32.totalorder %s1157_s23, 0 }
  0x6e   : > { %v572_v21 = vld [vmem:[%s1147_s4] ss:$0 sm:$0xff]  ;;  %s873_s9 = smov [#allocation8]  }
  0x6f   : > { %p796_p1 = pnand %p795_p11, %p1162_p0  ;;  %s798_s13 = sshll.u32 %s873_s9, 4  ;;  %s799_s13 = int_to_ptr.vmem [resolvable:$false] %s798_s13 }
  0x70   : > { %600 = vmatpush3.bf16.msra.mxu0 %v697_v2  ;;  %608 = vmatpush3.bf16.msra.mxu1 %v699_v6  ;;  %s800_s29 = scalar_lea.vmem %s799_s13, 256  ;;  %p801_p7 = scmp.lt.s32.totalorder %s1101_s7, %s799_s13 }
  0x71   : > { %609 = vmatprep.subr.bf16.mxu1 %v871_v0  ;;  %p797_p3 = pneg %p796_p1  ;;  %p802_p9 = scmp.lt.s32.totalorder %s800_s29, %s794_s16 }
  0x73   : > { %602 = vmatmul.mubr.msk.bf16.vlgmr.msra.gmra.mrb[0].mxu0 %vm312_vm1, %v293_v5  ;;  %p803_p12 = por %p802_p9, %p801_p7 }
  0x74   : > { %610 = vmatpush3.bf16.msra.mxu1 %v700_v7 }
  0x75   : > { %611 = vmatprep.subr.bf16.mxu1 %v871_v0  ;;  %p804_p2 = pnand %p803_p12, %p797_p3 }
  0x78   : > { %612 = vmatpush3.bf16.msra.mxu1 %v701_v8 }
  0x79   : > { %613 = vmatprep.subr.bf16.mxu1 %v871_v0 }
  0x7c   : > { %614 = vmatpush3.bf16.msra.mxu1 %v702_v9 }
  0x7d   : > { %615 = vmatprep.subr.bf16.mxu1 %v871_v0 }
  0x80   : > { %616 = vmatpush3.bf16.msra.mxu1 %v703_v10 }
  0x81   : > { %617 = vmatprep.subr.bf16.mxu1 %v871_v0 }
  0x84   : > { %618 = vmatpush3.bf16.msra.mxu1 %v704_v11 }
  0x85   : > { %619 = vmatprep.subr.bf16.mxu1 %v871_v0 }
  0x88   : > { %620 = vmatpush3.bf16.msra.mxu1 %v705_v12 }
 0x146   : > { %v350_v14 = vpop.f32.mrb[0].mxu0 }
 0x147   : > { %v351_v15 = vadd.f32 %v568_v13, %v350_v14  ;;  %v603_v16 = vpop.f32.mrb[1].mxu0 }
 0x148   : > { %v353_v17 = vpop.f32.mrb[2].mxu0 }
 0x149   : > { %706 = vtanh.f32 %v351_v15  ;;  %v604_v18 = vpop.f32.mrb[3].mxu0 }
 0x153   : > { %v707_v19 = vpop.eup %706 }
 0x154   : > { %v357_v20 = vpack.c.bf16 %v707_v19, %v707_v19 }
 0x156   : > { %622 = vmatmul.mubr.bf16.vlgmr.msra.gmra.mrb[0].mxu1 %v357_v20 }
 0x229   : > { %v446_v22 = vpop.f32.mrb[0].mxu1 }
 0x22a   : > { %v447_v23 = vadd.f32 %v572_v21, %v446_v22  ;;  %v623_v24 = vpop.f32.mrb[1].mxu1 }
 0x22b   : > { %v449_v25 = vpop.f32.mrb[2].mxu1 }
 0x22c   : > { %452 = vst [vmem:[%s268_s28] sm:$0xff] %v447_v23  ;;  %v624_v26 = vpop.f32.mrb[3].mxu1 }
 0x22d   : > { %807 = shalt.err (!%p804_p2)
}
 0x22e   : > { %s808_s12 = scalar_lea.hbm %s1099_s15, 128  ;;  %s812_s26 = scalar_lea.hbm %s1148_s5, 256 }
 0x22f   : > { %p809_p13 = scmp.ne.s32.totalorder %s1099_s15, %s808_s12  ;;  %p813_p4 = scmp.lt.u32.totalorder %s1099_s15, %s1148_s5 }
 0x230   : > { %p814_p5 = scmp.lt.u32.totalorder %s812_s26, %s808_s12  ;;  %p816_p11 = scmp.lt.u32.totalorder %s808_s12, %s1099_s15 }
 0x231   : > { %p810_p6 = pnand %p809_p13, %p1162_p0 }
 0x232   : > { %p815_p8 = por %p814_p5, %p813_p4 }
 0x233   : > { %p811_p10 = pneg %p810_p6 }
 0x234   : > { %p817_p1 = por %p816_p11, %p815_p8 }
 0x236   : > { %p818_p3 = pnand %p817_p1, %p811_p10 }
 0x238   : > { %821 = shalt.err (!%p818_p3)
}
 0x239   : > { %635 = dma.vmem_to_hbm [thread:$0]  (%p1162_p0), %s1101_s7, 128, %s1099_s15, %s454_s22  }
 0x23a PF: > { %s479_s11 = sand.u32 1, %s852_s18   ;;  %p1163_p7 = scmp.ne.s32.totalorder %s1153_s25, 0 }
 0x23b   : > { %p1164_p9 = scmp.ge.s32.totalorder %s864_s21, 2  ;;  %s480_s28 = scalar_lea.sflag [#allocation4], %s479_s11 }
 0x23d   : > { %p649_p12 = pnand %p1164_p9, %p1163_p7 }
 0x23f   : > { %847 = dma.done.wait (!%p649_p12), %s480_s28, 128  }
 0x240   : > { %849 = vsyncadd (!%p649_p12), %s480_s28, 4294967168  ;;  %p19_p2 = scmp.ge.s32.totalorder %s1014_s14, 4   ;;  %s1165_s18 = smov %s856_s19 }
 0x241   : > { %s1166_s19 = smov %s860_s20  ;;  %s1167_s20 = smov %s1030_s27 }
 0x242   : > { %s1168_s21 = smov %s1014_s14  ;;  %21 = sbr.rel (!%p19_p2) target bundleno = 6 (0x6), region = 93 }
 0x249   :  { %485 = vsyncpa [#allocation3], 1 }
 0x24a   :  { %487 = vsyncpa [#allocation3 + $0x1], 1 }
 0x24b   :  { %488 = vsyncpa [#allocation6], 1 }
 0x24c   :  { %489 = vsyncpa [#allocation4], 1 }
 0x24d   :  { %491 = vsyncpa [#allocation4 + $0x1], 1 }

</bundles_post_ra>
